<compile_context>
chip_gen: v5e
topology: v5e:2x2
jax: 0.10.0
libtpu: 0.0.40
codegen_flags: <defaults>
</compile_context>

<pallas_src>
import functools
import math

import jax
import jax.numpy as jnp
from jax.experimental import pallas as pl
from jax.experimental.pallas import tpu as pltpu

_LANE = 128
_MAX_ROW_BLOCK = 1024   # rows of 128 lanes -> 512 KiB f32 per T slice
_MAX_T_BLOCK = 8        # T slices accumulated per grid step


def _cdiv(a, b):
    return -(-a // b)


def _mean_dim_kernel(x_ref, o_ref, *scratch, n_t, t_block):
    """Grid = (row_blocks, t_blocks); accumulate sum over T, scale by 1/T."""
    acc_ref = scratch[0] if scratch else o_ref
    t = pl.program_id(1)

    @pl.when(t == 0)
    def _():
        acc_ref[...] = jnp.zeros_like(acc_ref)

    x = x_ref[...].astype(jnp.float32)          # (Tt, Rb, 128)
    if n_t % t_block != 0:
        # Final T block is partial: zero the out-of-range slices.
        valid = n_t - t * t_block
        tids = jax.lax.broadcasted_iota(jnp.int32, x.shape, 0)
        x = jnp.where(tids < valid, x, 0.0)
    acc_ref[...] += jnp.sum(x, axis=0)

    @pl.when(t == pl.num_programs(1) - 1)
    def _():
        inv = jnp.float32(1.0 / n_t)
        if scratch:
            o_ref[...] = (acc_ref[...] * inv).astype(o_ref.dtype)
        else:
            o_ref[...] = o_ref[...] * inv


def mean_dim(x, dim=0):
    """Pallas implementation of torch.Tensor.mean(dim)."""
    x = jnp.asarray(x)
    dim = dim % x.ndim

    # TODO(synk): for interior dims a (pre, T, post)-tiled kernel would avoid
    # this HBM transpose; dim=0 (the module default) is copy-free.
    x_moved = jnp.moveaxis(x, dim, 0) if dim != 0 else x
    out_shape = x_moved.shape[1:]
    T = x_moved.shape[0]
    M = math.prod(out_shape) if out_shape else 1

    out_dtype = x.dtype if jnp.issubdtype(x.dtype, jnp.floating) else jnp.float32
    if T == 0 or M == 0:
        return jnp.mean(x_moved.astype(out_dtype), axis=0)

    # Lane-dense slab (T, R, 128); pad flattened axis only when necessary.
    M_pad = _cdiv(M, _LANE) * _LANE
    x_flat = x_moved.reshape(T, M)
    if M_pad != M:
        x_flat = jnp.pad(x_flat, ((0, 0), (0, M_pad - M)))
    R = M_pad // _LANE
    x_slab = x_flat.reshape(T, R, _LANE)

    # Row tiling: block second-to-last dim must be a multiple of the packed
    # sublane count, or equal to the full axis.
    pack = max(1, 4 // jnp.dtype(x.dtype).itemsize)
    sub = 8 * pack
    if R <= _MAX_ROW_BLOCK:
        Rb = R                                   # full axis -> exempt
    else:
        n_blocks = _cdiv(R, _MAX_ROW_BLOCK)
        Rb = _cdiv(_cdiv(R, n_blocks), sub) * sub
    n_r = _cdiv(R, Rb)

    Tt = min(T, _MAX_T_BLOCK)
    n_t_blocks = _cdiv(T, Tt)

    use_scratch = jnp.dtype(out_dtype) != jnp.dtype(jnp.float32)
    scratch_shapes = [pltpu.VMEM((Rb, _LANE), jnp.float32)] if use_scratch else []

    kernel = functools.partial(_mean_dim_kernel, n_t=T, t_block=Tt)

    out = pl.pallas_call(
        kernel,
        out_shape=jax.ShapeDtypeStruct((R, _LANE), out_dtype),
        grid_spec=pltpu.PrefetchScalarGridSpec(
            num_scalar_prefetch=0,
            grid=(n_r, n_t_blocks),
            in_specs=[pl.BlockSpec((Tt, Rb, _LANE), lambda r, t: (t, r, 0))],
            out_specs=pl.BlockSpec((Rb, _LANE), lambda r, t: (r, 0)),
            scratch_shapes=scratch_shapes,
        ),
        compiler_params=pltpu.CompilerParams(
            dimension_semantics=("parallel", "arbitrary"),
            vmem_limit_bytes=32 * 1024 * 1024,
        ),
    )(x_slab)

    out = out.reshape(M_pad)[:M].reshape(out_shape)
    return out


if __name__ == "__main__":
    key = jax.random.PRNGKey(0)

    # Spiking-decoder-style input: (seq=8, batch=2, channels=4, H=16, W=16);
    # MeanDim(dim=0) averages over the time dimension.
    x = jax.random.normal(key, (8, 2, 4, 16, 16), dtype=jnp.float32)
    y = jax.block_until_ready(mean_dim(x, dim=0))
    y_ref = jnp.mean(x, axis=0)
    assert y.shape == y_ref.shape, (y.shape, y_ref.shape)
    assert jnp.allclose(y, y_ref, atol=1e-6, rtol=1e-6)

    # Ragged / narrow-dtype path: T not a multiple of the T block, flattened
    # size not a multiple of 128, bf16 output (exercises scratch accumulator).
    x2 = jax.random.normal(jax.random.PRNGKey(1), (11, 3, 5, 9, 7),
                           dtype=jnp.bfloat16)
    y2 = jax.block_until_ready(mean_dim(x2, dim=0))
    y2_ref = jnp.mean(x2.astype(jnp.float32), axis=0)
    assert y2.shape == y2_ref.shape, (y2.shape, y2_ref.shape)
    assert jnp.allclose(y2.astype(jnp.float32), y2_ref, atol=2e-2, rtol=2e-2)

    print("KERNEL_OK")
</pallas_src>

<mosaic_0001>
module attributes {stable_mosaic.version = 11 : i64} {
  func.func @_mean_dim_kernel(%arg0: i32, %arg1: i32, %arg2: memref<8x16x128xf32, #tpu.memory_space<vmem>>, %arg3: memref<16x128xf32, #tpu.memory_space<vmem>>) attributes {dimension_semantics = [#tpu.dimension_semantics<parallel>, #tpu.dimension_semantics<arbitrary>], iteration_bounds = array<i64: 1, 1>, scalar_prefetch = 0 : i64, scratch_operands = 0 : i64, tpu.core_type = #tpu.core_type<tc>, window_params = [{transform_indices = @transform_0, window_bounds = array<i64: 8, 16, 128>}, {transform_indices = @transform_1, window_bounds = array<i64: 16, 128>}]} {
    %c0_i32 = arith.constant 0 : i32
    %0 = arith.cmpi eq, %arg1, %c0_i32 : i32
    %1 = arith.extui %0 : i1 to i32
    %c0_i32_0 = arith.constant 0 : i32
    %2 = arith.cmpi ne, %1, %c0_i32_0 : i32
    scf.if %2 {
      %cst_9 = arith.constant 0.000000e+00 : f32
      %11 = vector.broadcast %cst_9 : f32 to vector<16x128xf32>
      %c0_10 = arith.constant 0 : index
      %c0_11 = arith.constant 0 : index
      %12 = vector.load %arg3[%c0_10, %c0_11] : memref<16x128xf32, #tpu.memory_space<vmem>>, vector<16x128xf32>
      tpu.vector_store %arg3[%c0_10, %c0_11], %11 {strides = array<i32>} : memref<16x128xf32, #tpu.memory_space<vmem>>, vector<16x128xf32>,
    } else {
    }
    %c0 = arith.constant 0 : index
    %c0_1 = arith.constant 0 : index
    %c0_2 = arith.constant 0 : index
    %3 = vector.load %arg2[%c0, %c0_1, %c0_2] : memref<8x16x128xf32, #tpu.memory_space<vmem>>, vector<8x16x128xf32>
    %c0_3 = arith.constant 0 : index
    %c0_4 = arith.constant 0 : index
    %4 = vector.load %arg3[%c0_3, %c0_4] : memref<16x128xf32, #tpu.memory_space<vmem>>, vector<16x128xf32>
    %cst = arith.constant dense<0.000000e+00> : vector<16x128xf32>
    %5 = vector.multi_reduction <add>, %3, %cst [0] : vector<8x16x128xf32> to vector<16x128xf32>
    %6 = arith.addf %4, %5 : vector<16x128xf32>
    %c0_5 = arith.constant 0 : index
    %c0_6 = arith.constant 0 : index
    %7 = vector.load %arg3[%c0_5, %c0_6] : memref<16x128xf32, #tpu.memory_space<vmem>>, vector<16x128xf32>
    tpu.vector_store %arg3[%c0_5, %c0_6], %6 {strides = array<i32>} : memref<16x128xf32, #tpu.memory_space<vmem>>, vector<16x128xf32>,
    %c0_i32_7 = arith.constant 0 : i32
    %8 = arith.cmpi eq, %arg1, %c0_i32_7 : i32
    %9 = arith.extui %8 : i1 to i32
    %c0_i32_8 = arith.constant 0 : i32
    %10 = arith.cmpi ne, %9, %c0_i32_8 : i32
    scf.if %10 {
      %c0_9 = arith.constant 0 : index
      %c0_10 = arith.constant 0 : index
      %11 = vector.load %arg3[%c0_9, %c0_10] : memref<16x128xf32, #tpu.memory_space<vmem>>, vector<16x128xf32>
      %cst_11 = arith.constant 1.250000e-01 : f32
      %12 = vector.broadcast %cst_11 : f32 to vector<16x128xf32>
      %13 = arith.mulf %11, %12 : vector<16x128xf32>
      %c0_12 = arith.constant 0 : index
      %c0_13 = arith.constant 0 : index
      %14 = vector.load %arg3[%c0_12, %c0_13] : memref<16x128xf32, #tpu.memory_space<vmem>>, vector<16x128xf32>
      tpu.vector_store %arg3[%c0_12, %c0_13], %13 {strides = array<i32>} : memref<16x128xf32, #tpu.memory_space<vmem>>, vector<16x128xf32>,
    } else {
    }
    return
  }
  func.func @transform_0(%arg0: i32, %arg1: i32) -> (i32, i32, i32) {
    %c0_i32 = arith.constant 0 : i32
    %c0_i32_0 = arith.constant 0 : i32
    return %arg1, %arg0, %c0_i32 : i32, i32, i32
  }
  func.func @transform_1(%arg0: i32, %arg1: i32) -> (i32, i32) {
    %c0_i32 = arith.constant 0 : i32
    %c0_i32_0 = arith.constant 0 : i32
    return %arg0, %c0_i32 : i32, i32
  }
}

</mosaic_0001>

<bundles_post_ra>
// kernel: tpu_custom_call.1
= control target key start
LH: loop header
LB: loop body
LE: loop exit
PB: predicated region body
PF: predicated region fallthrough
CT: control target
= control target key end

     0   :  { %6 = vsyncpa [#allocation3], 0  ;;  %s178_s0 = inlined_call_operand.hbm [shape: f32[8,16,128], index: 0, kind: input, shape index: {}]   ;;  %s179_s1 = inlined_call_operand.hbm [shape: f32[16,128], index: 1, kind: output, shape index: {}]  }
   0x1   :  { %7 = vsyncpa [#allocation4], 0  ;;  %s12_s8 = sshll.u32 %s178_s0, 4  ;;  %s152_s9 = smov [#allocation2]   ;;  %s13_s8 = int_to_ptr.hbm [resolvable:$true] %s12_s8 }
   0x2   :  { %s14_s10 = sshll.u32 %s152_s9, 4  ;;  %s153_s11 = smov 128   ;;  %s15_s10 = int_to_ptr.vmem [resolvable:$true] %s14_s10 }
   0x3   :  { %s154_s12 = smov 8  }
   0x4   :  { %20 = dma.hbm_to_vmem [thread:$0]  %s13_s8, 2048, %s15_s10, [#allocation3], %s153_s11, %s153_s11, %s154_s12  }
   0x5   :  { %148 = dma.done.wait [#allocation3], 2048  }
   0x6   :  { %149 = vsyncadd [#allocation3], 4294965248  ;;  %v31_v0 = vld [vmem:[#allocation2] sm:$0xff]  ;;  %v33_v1 = vld [vmem:[#allocation2 + $0x10] sm:$0xff]  ;;  %s155_s0 = smov [#allocation5]   ;;  %s82_s16 = sshll.u32 %s179_s1, 4  ;;  %s83_s16 = int_to_ptr.hbm [resolvable:$true] %s82_s16 }
   0x7   :  { %v35_v2 = vld [vmem:[#allocation2 + $0x20] sm:$0xff]  ;;  %v49_v3 = vadd.f32 %v33_v1, %v31_v0  ;;  %v37_v4 = vld [vmem:[#allocation2 + $0x30] sm:$0xff]  ;;  %v32_v5 = vld [vmem:[#allocation2 + $0x8] sm:$0xff]  ;;  %s80_s13 = sshll.u32 %s155_s0, 4  ;;  %s81_s13 = int_to_ptr.vmem [resolvable:$true] %s80_s13 }
   0x8   :  { %v34_v7 = vld [vmem:[#allocation2 + $0x18] sm:$0xff]  ;;  %v36_v8 = vld [vmem:[#allocation2 + $0x28] sm:$0xff]  ;;  %v39_v9 = vld [vmem:[#allocation2 + $0x40] sm:$0xff] }
   0x9   :  { %v50_v6 = vadd.f32 %v49_v3, %v35_v2  ;;  %v56_v10 = vadd.f32 %v34_v7, %v32_v5  ;;  %v38_v12 = vld [vmem:[#allocation2 + $0x38] sm:$0xff]  ;;  %v41_v13 = vld [vmem:[#allocation2 + $0x50] sm:$0xff]  ;;  %v40_v16 = vld [vmem:[#allocation2 + $0x48] sm:$0xff] }
   0xa   :  { %v43_v17 = vld [vmem:[#allocation2 + $0x60] sm:$0xff]  ;;  %v42_v20 = vld [vmem:[#allocation2 + $0x58] sm:$0xff]  ;;  %v45_v21 = vld [vmem:[#allocation2 + $0x70] sm:$0xff] }
   0xb   :  { %v51_v11 = vadd.f32 %v50_v6, %v37_v4  ;;  %v57_v14 = vadd.f32 %v56_v10, %v36_v8  ;;  %v44_v24 = vld [vmem:[#allocation2 + $0x68] sm:$0xff]  ;;  %v46_v27 = vld [vmem:[#allocation2 + $0x78] sm:$0xff] }
   0xd   :  { %v52_v15 = vadd.f32 %v51_v11, %v39_v9  ;;  %v58_v18 = vadd.f32 %v57_v14, %v38_v12 }
   0xf   :  { %v53_v19 = vadd.f32 %v52_v15, %v41_v13  ;;  %v59_v22 = vadd.f32 %v58_v18, %v40_v16 }
  0x11   :  { %v54_v23 = vadd.f32 %v53_v19, %v43_v17  ;;  %v60_v25 = vadd.f32 %v59_v22, %v42_v20 }
  0x13   :  { %v55_v26 = vadd.f32 %v54_v23, %v45_v21  ;;  %v61_v28 = vadd.f32 %v60_v25, %v44_v24 }
  0x15   :  { %v62_v29 = vadd.f32 %v61_v28, %v46_v27  ;;  %v72_v30 = vmul.f32 0.125, %v55_v26 }
  0x17   :  { %74 = vst [vmem:[#allocation5] sm:$0xff] %v72_v30  ;;  %v73_v31 = vmul.f32 0.125, %v62_v29 }
  0x19   :  { %75 = vst [vmem:[#allocation5 + $0x8] sm:$0xff] %v73_v31 }
  0x1a   :  { %88 = dma.vmem_to_hbm [thread:$0]  %s81_s13, 256, %s83_s16, [#allocation4], %s153_s11, %s153_s11, %s154_s12  }
  0x1b   :  { %150 = dma.done.wait [#allocation4], 256  }
  0x1c   :  { %151 = vsyncadd [#allocation4], 4294967040 }
  0x1d   :  { %93 = vsyncpa [#allocation3], 1 }
  0x1e   :  { %94 = vsyncpa [#allocation4], 1 }

</bundles_post_ra>
